<compile_context>
chip_gen: v7x
topology: tpu7x:2x2x1
jax: 0.10.0
libtpu: 0.0.40
codegen_flags: <defaults>
</compile_context>

<pallas_src>
import functools

import jax
import jax.numpy as jnp
from jax.experimental import pallas as pl
from jax.experimental.pallas import tpu as pltpu

_LANES = 128
_SUBLANES = 8
_BLOCK_ELEMS = _SUBLANES * _LANES          # 1024 elements = one f32 vreg
_MAX_BLOCK_ROWS = 8192                     # (8192, 128) f32 = 4 MiB / input / buffer
_NUM_CORES = 2                             # leading "parallel" grid axis (v7x megacore)


def _round_up(x, m):
    return ((x + m - 1) // m) * m


def _combi_sums_kernel(pred_ref, lab_ref, out_ref, *, valid_rows, need_row_mask):
    c = pl.program_id(0)          # parallel (core) axis
    i = pl.program_id(1)          # sequential row-block axis

    @pl.when(i == 0)
    def _init():
        out_ref[...] = jnp.zeros_like(out_ref)

    diff = pred_ref[...].astype(jnp.float32) - lab_ref[...].astype(jnp.float32)
    block_rows = pred_ref.shape[0]

    def _accumulate(d):
        # (block_rows,128) -> (block_rows//8, 8, 128) is tile-aligned (a view);
        # the axis-0 reduce is a VALU tree into a single (8,128) vreg partial sum.
        out_ref[0, 0] += jnp.sum(jnp.square(d).reshape(-1, _SUBLANES, _LANES), axis=0)
        out_ref[0, 1] += jnp.sum(jnp.abs(d).reshape(-1, _SUBLANES, _LANES), axis=0)

    if need_row_mask:  # static Python bool: only the last global block is ragged
        is_last = jnp.logical_and(c == pl.num_programs(0) - 1,
                                  i == pl.num_programs(1) - 1)

        @pl.when(jnp.logical_not(is_last))
        def _accum_full():
            _accumulate(diff)

        @pl.when(is_last)
        def _accum_masked():
            gb = c * pl.num_programs(1) + i              # global block index
            row_ids = (jax.lax.broadcasted_iota(jnp.int32, diff.shape, 0)
                       + gb * block_rows)
            _accumulate(jnp.where(row_ids < valid_rows, diff, 0.0))
    else:
        _accumulate(diff)


def _sum_sq_and_abs(predictions, labels, *, max_block_rows=_MAX_BLOCK_ROWS):
    """Returns (sum((p - l)^2), sum(|p - l|)) over all elements, in float32."""
    assert predictions.shape == labels.shape, (predictions.shape, labels.shape)
    n = predictions.size

    p_flat = predictions.reshape(-1)
    l_flat = labels.reshape(-1)

    main = (n // _BLOCK_ELEMS) * _BLOCK_ELEMS
    tail = n - main

    if tail:
        # Rare ragged tail (< 1024 elements): tiny plain-jnp reduction instead of
        # padding (which would copy both full arrays before a bandwidth-bound kernel).
        tp = p_flat[main:].astype(jnp.float32)
        tl = l_flat[main:].astype(jnp.float32)
        td = tp - tl
        tail_sq = jnp.sum(td * td)
        tail_abs = jnp.sum(jnp.abs(td))
    else:
        tail_sq = jnp.float32(0.0)
        tail_abs = jnp.float32(0.0)

    if main == 0:
        return tail_sq, tail_abs

    rows = main // _LANES                                  # multiple of 8 by construction
    p2 = (p_flat[:main] if tail else p_flat).reshape(rows, _LANES)
    l2 = (l_flat[:main] if tail else l_flat).reshape(rows, _LANES)

    # ---- block / core planning --------------------------------------------
    max_block_rows = max(_SUBLANES, (max_block_rows // _SUBLANES) * _SUBLANES)
    target_blocks = pl.cdiv(rows, max_block_rows)
    if rows >= 2 * _SUBLANES * _NUM_CORES:
        # Aim for an even number of blocks so the "parallel" axis can give each
        # TensorCore (v7x) its own contiguous half of the rows.
        target_blocks = _round_up(max(target_blocks, _NUM_CORES), _NUM_CORES)
    block_rows = min(max_block_rows,
                     _round_up(pl.cdiv(rows, target_blocks), _SUBLANES))
    num_blocks = pl.cdiv(rows, block_rows)     # every block index has >=1 valid row
    cores = _NUM_CORES if num_blocks % _NUM_CORES == 0 else 1
    bpc = num_blocks // cores                  # blocks per core
    need_row_mask = (rows % block_rows) != 0   # only the last global block is ragged

    in_spec = pl.BlockSpec((block_rows, _LANES), lambda c, i: (c * bpc + i, 0))
    out_spec = pl.BlockSpec((1, 2, _SUBLANES, _LANES), lambda c, i: (c, 0, 0, 0))

    kernel = functools.partial(_combi_sums_kernel,
                               valid_rows=rows,
                               need_row_mask=need_row_mask)

    partials = pl.pallas_call(
        kernel,
        out_shape=jax.ShapeDtypeStruct((cores, 2, _SUBLANES, _LANES), jnp.float32),
        grid_spec=pltpu.PrefetchScalarGridSpec(
            num_scalar_prefetch=0,
            grid=(cores, bpc),
            in_specs=[in_spec, in_spec],
            out_specs=out_spec,
        ),
        compiler_params=pltpu.CompilerParams(
            dimension_semantics=("parallel", "arbitrary"),
            vmem_limit_bytes=32 * 1024 * 1024),
    )(p2, l2)

    sum_sq = jnp.sum(partials[:, 0]) + tail_sq
    sum_abs = jnp.sum(partials[:, 1]) + tail_abs
    return sum_sq, sum_abs


def combi_loss(predictions, labels, inputs=None, alpha=1.0,
               *, max_block_rows=_MAX_BLOCK_ROWS):
    """Pallas implementation of CombiLoss.forward with the default nn.L1Loss()
    secondary loss: alpha * MSE(pred, labels) + (1 - alpha) * L1(pred, labels)."""
    # TODO(synk): the EnergyLoss secondary-loss branch (yaml normalization info,
    # IFC67 water EOS, torch.gradient / conv2d physics residual) is not
    # translated; `inputs` is accepted but unused for the default L1 path.
    del inputs
    sum_sq, sum_abs = _sum_sq_and_abs(predictions, labels,
                                      max_block_rows=max_block_rows)
    inv_n = 1.0 / float(predictions.size)
    mse = sum_sq * inv_n
    mae = sum_abs * inv_n
    return alpha * mse + (1.0 - alpha) * mae


def _reference(predictions, labels, alpha):
    mse = jnp.mean(jnp.square(predictions - labels))
    mae = jnp.mean(jnp.abs(predictions - labels))
    return alpha * mse + (1.0 - alpha) * mae


if __name__ == "__main__":
    key = jax.random.PRNGKey(0)
    keys = jax.random.split(key, 10)

    # 1) Small NCHW pair: single block, single core, no masking, no tail.
    pred = jax.random.uniform(keys[0], (2, 4, 16, 16), jnp.float32)
    labl = jax.random.uniform(keys[1], (2, 4, 16, 16), jnp.float32)
    out = jax.block_until_ready(combi_loss(pred, labl, inputs=None, alpha=0.6))
    ref = _reference(pred, labl, 0.6)
    assert jnp.allclose(out, ref, rtol=1e-4, atol=1e-6), (out, ref)

    # 2) Larger case: two blocks, 2-core parallel split, no masking.
    pred2 = jax.random.normal(keys[2], (2, 4, 160, 160), jnp.float32)
    labl2 = jax.random.normal(keys[3], (2, 4, 160, 160), jnp.float32)
    out2 = jax.block_until_ready(combi_loss(pred2, labl2, inputs=None, alpha=1.0))
    ref2 = _reference(pred2, labl2, 1.0)
    assert jnp.allclose(out2, ref2, rtol=1e-4, atol=1e-6), (out2, ref2)

    # 3) Small max_block_rows override: multi-block grid, 2-core split, ragged
    #    last block exercising the pl.when-gated row mask.
    pred3 = jax.random.normal(keys[4], (2, 4, 201, 128), jnp.float32)
    labl3 = jax.random.normal(keys[5], (2, 4, 201, 128), jnp.float32)
    out3 = jax.block_until_ready(
        combi_loss(pred3, labl3, inputs=None, alpha=0.3, max_block_rows=512))
    ref3 = _reference(pred3, labl3, 0.3)
    assert jnp.allclose(out3, ref3, rtol=1e-4, atol=1e-6), (out3, ref3)

    # 4) Kernel main path + small jnp tail (n not a multiple of 1024).
    pred4 = jax.random.normal(keys[6], (2, 4, 17, 16), jnp.float32)
    labl4 = jax.random.normal(keys[7], (2, 4, 17, 16), jnp.float32)
    out4 = jax.block_until_ready(combi_loss(pred4, labl4, inputs=None, alpha=0.5))
    ref4 = _reference(pred4, labl4, 0.5)
    assert jnp.allclose(out4, ref4, rtol=1e-4, atol=1e-6), (out4, ref4)

    # 5) Tiny array (< 1024 elements): pure-jnp fallback path.
    pred5 = jax.random.normal(keys[8], (2, 3, 11, 13), jnp.float32)
    labl5 = jax.random.normal(keys[9], (2, 3, 11, 13), jnp.float32)
    out5 = jax.block_until_ready(combi_loss(pred5, labl5, inputs=None, alpha=0.5))
    ref5 = _reference(pred5, labl5, 0.5)
    assert jnp.allclose(out5, ref5, rtol=1e-4, atol=1e-6), (out5, ref5)

    print("KERNEL_OK")
</pallas_src>

<mosaic_0001>
module attributes {stable_mosaic.version = 11 : i64} {
  func.func @_combi_sums_kernel(%arg0: i32, %arg1: i32, %arg2: memref<16x128xf32, #tpu.memory_space<vmem>>, %arg3: memref<16x128xf32, #tpu.memory_space<vmem>>, %arg4: memref<1x2x8x128xf32, #tpu.memory_space<vmem>>) attributes {dimension_semantics = [#tpu.dimension_semantics<parallel>, #tpu.dimension_semantics<arbitrary>], iteration_bounds = array<i64: 1, 1>, scalar_prefetch = 0 : i64, scratch_operands = 0 : i64, tpu.core_type = #tpu.core_type<tc>, window_params = [{transform_indices = @transform_0, window_bounds = array<i64: 16, 128>}, {transform_indices = @transform_1, window_bounds = array<i64: 16, 128>}, {transform_indices = @transform_2, window_bounds = array<i64: 1, 2, 8, 128>}]} {
    %c0_i32 = arith.constant 0 : i32
    %0 = arith.cmpi eq, %arg1, %c0_i32 : i32
    %1 = arith.extui %0 : i1 to i32
    %c0_i32_0 = arith.constant 0 : i32
    %2 = arith.cmpi ne, %1, %c0_i32_0 : i32
    scf.if %2 {
      %cst_20 = arith.constant 0.000000e+00 : f32
      %24 = vector.broadcast %cst_20 : f32 to vector<1x2x8x128xf32>
      %c0_21 = arith.constant 0 : index
      %c0_22 = arith.constant 0 : index
      %c0_23 = arith.constant 0 : index
      %c0_24 = arith.constant 0 : index
      %25 = vector.load %arg4[%c0_21, %c0_22, %c0_23, %c0_24] : memref<1x2x8x128xf32, #tpu.memory_space<vmem>>, vector<1x2x8x128xf32>
      tpu.vector_store %arg4[%c0_21, %c0_22, %c0_23, %c0_24], %24 {strides = array<i32>} : memref<1x2x8x128xf32, #tpu.memory_space<vmem>>, vector<1x2x8x128xf32>,
    } else {
    }
    %c0 = arith.constant 0 : index
    %c0_1 = arith.constant 0 : index
    %3 = vector.load %arg2[%c0, %c0_1] : memref<16x128xf32, #tpu.memory_space<vmem>>, vector<16x128xf32>
    %c0_2 = arith.constant 0 : index
    %c0_3 = arith.constant 0 : index
    %4 = vector.load %arg3[%c0_2, %c0_3] : memref<16x128xf32, #tpu.memory_space<vmem>>, vector<16x128xf32>
    %5 = arith.subf %3, %4 : vector<16x128xf32>
    %c0_4 = arith.constant 0 : index
    %c0_5 = arith.constant 0 : index
    %c0_6 = arith.constant 0 : index
    %c0_7 = arith.constant 0 : index
    %6 = vector.load %arg4[%c0_4, %c0_5, %c0_6, %c0_7] : memref<1x2x8x128xf32, #tpu.memory_space<vmem>>, vector<1x1x8x128xf32>
    %7 = vector.shape_cast %6 : vector<1x1x8x128xf32> to vector<8x128xf32>
    %8 = arith.mulf %5, %5 : vector<16x128xf32>
    %9 = vector.shape_cast %8 : vector<16x128xf32> to vector<2x8x128xf32>
    %cst = arith.constant dense<0.000000e+00> : vector<8x128xf32>
    %10 = vector.multi_reduction <add>, %9, %cst [0] : vector<2x8x128xf32> to vector<8x128xf32>
    %11 = arith.addf %7, %10 : vector<8x128xf32>
    %c0_8 = arith.constant 0 : index
    %c0_9 = arith.constant 0 : index
    %c0_10 = arith.constant 0 : index
    %c0_11 = arith.constant 0 : index
    %12 = vector.load %arg4[%c0_8, %c0_9, %c0_10, %c0_11] : memref<1x2x8x128xf32, #tpu.memory_space<vmem>>, vector<1x1x8x128xf32>
    %13 = vector.shape_cast %12 : vector<1x1x8x128xf32> to vector<8x128xf32>
    %14 = vector.shape_cast %11 : vector<8x128xf32> to vector<1x1x8x128xf32>
    tpu.vector_store %arg4[%c0_8, %c0_9, %c0_10, %c0_11], %14 {strides = array<i32>} : memref<1x2x8x128xf32, #tpu.memory_space<vmem>>, vector<1x1x8x128xf32>,
    %c0_12 = arith.constant 0 : index
    %c1 = arith.constant 1 : index
    %c0_13 = arith.constant 0 : index
    %c0_14 = arith.constant 0 : index
    %15 = vector.load %arg4[%c0_12, %c1, %c0_13, %c0_14] : memref<1x2x8x128xf32, #tpu.memory_space<vmem>>, vector<1x1x8x128xf32>
    %16 = vector.shape_cast %15 : vector<1x1x8x128xf32> to vector<8x128xf32>
    %17 = math.absf %5 : vector<16x128xf32>
    %18 = vector.shape_cast %17 : vector<16x128xf32> to vector<2x8x128xf32>
    %cst_15 = arith.constant dense<0.000000e+00> : vector<8x128xf32>
    %19 = vector.multi_reduction <add>, %18, %cst_15 [0] : vector<2x8x128xf32> to vector<8x128xf32>
    %20 = arith.addf %16, %19 : vector<8x128xf32>
    %c0_16 = arith.constant 0 : index
    %c1_17 = arith.constant 1 : index
    %c0_18 = arith.constant 0 : index
    %c0_19 = arith.constant 0 : index
    %21 = vector.load %arg4[%c0_16, %c1_17, %c0_18, %c0_19] : memref<1x2x8x128xf32, #tpu.memory_space<vmem>>, vector<1x1x8x128xf32>
    %22 = vector.shape_cast %21 : vector<1x1x8x128xf32> to vector<8x128xf32>
    %23 = vector.shape_cast %20 : vector<8x128xf32> to vector<1x1x8x128xf32>
    tpu.vector_store %arg4[%c0_16, %c1_17, %c0_18, %c0_19], %23 {strides = array<i32>} : memref<1x2x8x128xf32, #tpu.memory_space<vmem>>, vector<1x1x8x128xf32>,
    return
  }
  func.func @transform_0(%arg0: i32, %arg1: i32) -> (i32, i32) {
    %c1_i32 = arith.constant 1 : i32
    %0 = arith.muli %arg0, %c1_i32 : i32
    %1 = arith.addi %0, %arg1 : i32
    %c0_i32 = arith.constant 0 : i32
    %c0_i32_0 = arith.constant 0 : i32
    return %1, %c0_i32 : i32, i32
  }
  func.func @transform_1(%arg0: i32, %arg1: i32) -> (i32, i32) {
    %c1_i32 = arith.constant 1 : i32
    %0 = arith.muli %arg0, %c1_i32 : i32
    %1 = arith.addi %0, %arg1 : i32
    %c0_i32 = arith.constant 0 : i32
    %c0_i32_0 = arith.constant 0 : i32
    return %1, %c0_i32 : i32, i32
  }
  func.func @transform_2(%arg0: i32, %arg1: i32) -> (i32, i32, i32, i32) {
    %c0_i32 = arith.constant 0 : i32
    %c0_i32_0 = arith.constant 0 : i32
    %c0_i32_1 = arith.constant 0 : i32
    %c0_i32_2 = arith.constant 0 : i32
    return %arg0, %c0_i32, %c0_i32_0, %c0_i32_1 : i32, i32, i32, i32
  }
}

</mosaic_0001>

<bundles_post_ra>
// kernel: tpu_custom_call.1
= control target key start
LH: loop header
LB: loop body
LE: loop exit
PB: predicated region body
PF: predicated region fallthrough
CT: control target
= control target key end

     0   :  { %7 = vsyncpa [#allocation3], 0  ;;  %s238_s0 = inlined_call_operand.hbm [shape: f32[16,128], index: 0, kind: input, shape index: {}]   ;;  %s239_s1 = inlined_call_operand.hbm [shape: f32[16,128], index: 1, kind: input, shape index: {}]   ;;  %s240_s2 = inlined_call_operand.hbm [shape: f32[1,2,8,128], index: 2, kind: output, shape index: {}]  }
   0x1   :  { %8 = vsyncpa [#allocation6], 0 }
   0x2   :  { %9 = vsyncpa [#allocation4], 0  ;;  %s173_s9 = smov [#allocation2]   ;;  %s101_s13 = scalar_lea.hbm %s238_s0, 256 }
   0x3   :  { %s19_s10 = sshll.u32 %s173_s9, 4  ;;  %p102_p0 = scmp.ne.s32.totalorder %s238_s0, %s101_s13  ;;  %s20_s10 = int_to_ptr.vmem [resolvable:$true] %s19_s10 }
   0x4   :  { %p105_p1 = scmp.lt.u32.totalorder %s101_s13, %s238_s0 }
   0x6   :  { %p107_p2 = pnand %p105_p1, %p102_p0 }
   0x8   :  { %110 = shalt.err (!%p107_p2)
}
   0x9   :  { %s111_s18 = scalar_lea.vmem %s20_s10, 256  ;;  %p116_p4 = scmp.lt.s32.totalorder %s20_s10, %s20_s10 }
   0xa   :  { %p112_p3 = scmp.ne.s32.totalorder %s20_s10, %s111_s18  ;;  %p117_p5 = scmp.lt.s32.totalorder %s111_s18, %s111_s18 }
   0xc   :  { %p118_p6 = por %p117_p5, %p116_p4 }
   0xe   :  { %p119_p7 = pnand %p118_p6, %p112_p3 }
  0x10   :  { %122 = shalt.err (!%p119_p7)
}
  0x11   :  { %s174_s19 = smov 128   ;;  %s175_s20 = smov 8  }
  0x12   :  { %25 = dma.hbm_to_vmem [thread:$0]  %s238_s0, 256, %s20_s10, [#allocation3], %s174_s19, %s174_s19, %s175_s20  }
  0x13   :  { %s176_s23 = smov [#allocation5]   ;;  %s123_s27 = scalar_lea.hbm %s239_s1, 256 }
  0x14   :  { %s35_s24 = sshll.u32 %s176_s23, 4  ;;  %p124_p8 = scmp.ne.s32.totalorder %s239_s1, %s123_s27  ;;  %s36_s24 = int_to_ptr.vmem [resolvable:$true] %s35_s24 }
  0x15   :  { %p127_p9 = scmp.lt.u32.totalorder %s123_s27, %s239_s1 }
  0x17   :  { %p129_p10 = pnand %p127_p9, %p124_p8 }
  0x19   :  { %132 = shalt.err (!%p129_p10)
}
  0x1a   :  { %s133_s4 = scalar_lea.vmem %s36_s24, 256  ;;  %p138_p12 = scmp.lt.s32.totalorder %s36_s24, %s36_s24 }
  0x1b   :  { %p134_p11 = scmp.ne.s32.totalorder %s36_s24, %s133_s4  ;;  %p139_p13 = scmp.lt.s32.totalorder %s133_s4, %s133_s4 }
  0x1d   :  { %p140_p0 = por %p139_p13, %p138_p12 }
  0x1f   :  { %p141_p1 = pnand %p140_p0, %p134_p11 }
  0x21   :  { %144 = shalt.err (!%p141_p1)
}
  0x22   :  { %41 = dma.hbm_to_vmem [thread:$0]  %s239_s1, 256, %s36_s24, [#allocation6], %s174_s19, %s174_s19, %s175_s20  }
  0x23   :  { %167 = dma.done.wait [#allocation3], 256  }
  0x24   :  { %168 = vsyncadd [#allocation3], 4294967040 }
  0x25   :  { %169 = dma.done.wait [#allocation6], 256  }
  0x26   :  { %170 = vsyncadd [#allocation6], 4294967040  ;;  %v58_v0 = vld [vmem:[#allocation2] sm:$0xff]  ;;  %v59_v1 = vld [vmem:[#allocation2 + $0x8] sm:$0xff]  ;;  %s177_s6 = smov [#allocation7]  }
  0x27   :  { %v60_v2 = vld [vmem:[#allocation5] sm:$0xff]  ;;  %v61_v3 = vld [vmem:[#allocation5 + $0x8] sm:$0xff]  ;;  %s82_s7 = sshll.u32 %s177_s6, 4  ;;  %s83_s7 = int_to_ptr.vmem [resolvable:$true] %s82_s7 }
  0x28   :  { %v62_v4 = vsub.f32 %v58_v0, %v60_v2  ;;  %v63_v5 = vsub.f32 %v59_v1, %v61_v3  ;;  %s145_s1 = scalar_lea.vmem %s83_s7, 256  ;;  %p150_p3 = scmp.lt.s32.totalorder %s83_s7, %s83_s7 }
  0x29   :  { %p146_p2 = scmp.ne.s32.totalorder %s83_s7, %s145_s1  ;;  %p151_p4 = scmp.lt.s32.totalorder %s145_s1, %s145_s1 }
  0x2a   :  { %v65_v6 = vmul.f32 %v62_v4, %v62_v4  ;;  %v72_v7 = vand.u32 2147483647, %v62_v4  ;;  %v66_v8 = vmul.f32 %v63_v5, %v63_v5  ;;  %v73_v9 = vand.u32 2147483647, %v63_v5 }
  0x2b   :  { %p152_p5 = por %p151_p4, %p150_p3 }
  0x2c   :  { %v67_v10 = vadd.f32 %v66_v8, %v65_v6  ;;  %v74_v11 = vadd.f32 %v73_v9, %v72_v7 }
  0x2d   :  { %p153_p6 = pnand %p152_p5, %p146_p2 }
  0x2e   :  { %69 = vst [vmem:[#allocation7] sm:$0xff] %v67_v10  ;;  %76 = vst [vmem:[#allocation7 + $0x8] sm:$0xff] %v74_v11 }
  0x2f   :  { %156 = shalt.err (!%p153_p6)
}
  0x30   :  { %s157_s10 = scalar_lea.hbm %s240_s2, 256 }
  0x31   :  { %p158_p7 = scmp.ne.s32.totalorder %s240_s2, %s157_s10  ;;  %p161_p8 = scmp.lt.u32.totalorder %s157_s10, %s240_s2 }
  0x33   :  { %p163_p9 = pnand %p161_p8, %p158_p7 }
  0x35   :  { %166 = shalt.err (!%p163_p9)
}
  0x36   :  { %88 = dma.vmem_to_hbm [thread:$0]  %s83_s7, 256, %s240_s2, [#allocation4], %s174_s19, %s174_s19, %s175_s20  }
  0x37   :  { %171 = dma.done.wait [#allocation4], 256  }
  0x38   :  { %172 = vsyncadd [#allocation4], 4294967040 }
  0x39   :  { %92 = vsyncpa [#allocation3], 1 }
  0x3a   :  { %93 = vsyncpa [#allocation6], 1 }
  0x3b   :  { %94 = vsyncpa [#allocation4], 1 }

</bundles_post_ra>
